<compile_context>
chip_gen: v6e
topology: v6e:2x2x1
jax: 0.10.0
libtpu: 0.0.40
codegen_flags: <defaults>
</compile_context>

<pallas_src>
import functools

import jax
import jax.numpy as jnp
import numpy as np
from jax.experimental import pallas as pl
from jax.experimental.pallas import tpu as pltpu


def _best_sample_kernel(targeted, p_is_inf, num_classes, n_rows, tile_n, nb,
                        x_ref, w_ref, b_ref, gen_ref, labels_ref,
                        bestd_ref, found_ref, best_hbm,
                        out_ref, newbest_hbm, newbestd_ref, newfound_ref,
                        blend_ref, flag_ref, dma_sem):
    i = pl.program_id(0)
    x = x_ref[...]                                               # (TN, D) f32

    # ---- model forward: linear classifier on the MXU (lane-dense K_pad) ----
    scores = jnp.dot(x, w_ref[...],
                     preferred_element_type=jnp.float32) + b_ref[...]   # (TN, Kp)
    out_ref[...] = scores

    # ---- argmax over the real classes (first index achieving the max) ----
    ids = jax.lax.broadcasted_iota(jnp.int32, scores.shape, 1)   # (TN, Kp)
    valid = ids < num_classes                                    # mask pad cols
    masked = jnp.where(valid, scores, -jnp.inf)
    maxv = jnp.max(masked, axis=1, keepdims=True)                # (TN, 1)
    cand = jnp.where(masked >= maxv, ids, scores.shape[1])
    pred = jnp.min(cand, axis=1, keepdims=True)                  # (TN, 1) int32

    labels = labels_ref[...]                                     # (TN, 1) int32
    if targeted:
        successful = pred == labels
    else:
        successful = pred != labels                              # (TN, 1) bool

    # ---- adversarial distance: Lp norm of (x - genuines) per sample ----
    diff = x - gen_ref[...]                                      # (TN, D)
    if p_is_inf:
        dist = jnp.max(jnp.abs(diff), axis=1, keepdims=True)     # (TN, 1)
    else:  # p == 2
        dist = jnp.sqrt(jnp.sum(diff * diff, axis=1, keepdims=True))

    bestd = bestd_ref[...]                                       # (TN, 1) f32
    found = found_ref[...] != 0                                  # (TN, 1) bool
    better = dist < bestd
    replace = successful & (better | jnp.logical_not(found))     # (TN, 1) bool

    # Ragged-tail mask: never let garbage rows of the last (partial) tile
    # trigger a replacement or a spurious best-update DMA.
    row_ids = jax.lax.broadcasted_iota(jnp.int32, replace.shape, 0)
    replace = replace & ((row_ids + i * tile_n) < n_rows)

    # ---- cheap tracker scalars: streamed back via the auto pipeline ----
    newbestd_ref[...] = jnp.where(replace, dist, bestd)
    newfound_ref[...] = (found | replace).astype(jnp.int32)

    # ---- best samples: conditional manual DMA on the aliased HBM buffer ----
    # flag = 1.0 iff any row of this tile replaces its best sample.
    flag_ref[...] = jnp.max(replace.astype(jnp.float32), axis=0, keepdims=True)
    any_rep = flag_ref[0, 0] > 0.0

    row0 = i * tile_n
    if tile_n % 8 == 0:
        row0 = pl.multiple_of(row0, 8)

    def update_best(rows):
        # Read current best rows (aliased buffer holds old best), blend, write.
        rd = pltpu.make_async_copy(best_hbm.at[pl.ds(row0, rows)],
                                   blend_ref.at[pl.ds(0, rows)], dma_sem)
        rd.start()
        rd.wait()
        blend_ref[...] = jnp.where(replace, x, blend_ref[...])
        wr = pltpu.make_async_copy(blend_ref.at[pl.ds(0, rows)],
                                   newbest_hbm.at[pl.ds(row0, rows)], dma_sem)
        wr.start()
        wr.wait()

    tail = n_rows - (nb - 1) * tile_n        # static Python int, 1..tile_n
    if tail == tile_n:
        @pl.when(any_rep)
        def _():
            update_best(tile_n)
    else:
        not_tail = i < nb - 1

        @pl.when(jnp.logical_and(any_rep, not_tail))
        def _():
            update_best(tile_n)

        @pl.when(jnp.logical_and(any_rep, jnp.logical_not(not_tail)))
        def _():
            update_best(tail)


def _choose_tile(n, d, k_pad):
    """Generation-aware batch-tile size and scoped-VMEM limit."""
    try:
        vmem_cap = int(pltpu.get_tpu_info().vmem_capacity_bytes)
    except Exception:
        vmem_cap = 64 << 20                       # conservative (v7x per-TC)
    # Headroom for compiler-internal scratch / semaphores / small blocks.
    vmem_limit = int(min(max(vmem_cap - (16 << 20), 32 << 20), 100 << 20))

    w_bytes = (d * k_pad + k_pad) * 4             # single-buffered resident W, b
    # Per-row block bytes: x + genuines double-buffered (16*D) + blend scratch
    # (4*D) + scores out (2 * K_pad lanes) + five (TN,1) blocks padded to 128
    # lanes, double-buffered.
    per_row = 20 * d + 8 * k_pad + 10 * 128 * 4
    avail = max(vmem_limit - w_bytes - (6 << 20), 4 << 20)
    tile = max(8, min(1024, (avail // per_row) // 8 * 8))

    if tile >= n:
        if n >= 16:
            # Whole batch fits in one tile; still split in two so both v7x
            # TensorCores get work under dimension_semantics=("parallel",).
            tile = ((n + 1) // 2 + 7) // 8 * 8
        else:
            tile = n                              # full-extent block (no 8-pad)
    return tile, vmem_limit


def best_sample_forward(x_nchw, w, b, genuines_nchw, labels, best_nchw,
                        best_distances, found_adversarial,
                        *, targeted=False, p=2.0):
    """Functional equivalent of BestSampleWrapper.forward.

    Returns (outputs, new_best, new_best_distances, new_found_adversarial).
    """
    n = x_nchw.shape[0]
    # mirrors: assert len(x) == len(self.tracker.genuines)
    assert genuines_nchw.shape[0] == n
    d = int(np.prod(x_nchw.shape[1:]))
    k = int(w.shape[1])
    k_pad = ((k + 127) // 128) * 128              # lane-dense class axis

    tile_n, vmem_limit = _choose_tile(n, d, k_pad)
    nb = -(-n // tile_n)

    # No (N, D) padding copies: reshapes/astype of contiguous f32 are free.
    x2 = x_nchw.reshape(n, d).astype(jnp.float32)
    gen2 = genuines_nchw.reshape(n, d).astype(jnp.float32)
    best2 = best_nchw.reshape(n, d).astype(jnp.float32)
    labels2 = labels.reshape(n, 1).astype(jnp.int32)
    bestd2 = best_distances.reshape(n, 1).astype(jnp.float32)
    found2 = found_adversarial.reshape(n, 1).astype(jnp.int32)
    w2 = jnp.pad(w.astype(jnp.float32), ((0, 0), (0, k_pad - k)))
    b2 = jnp.pad(b.astype(jnp.float32).reshape(1, k), ((0, 0), (0, k_pad - k)))

    # TODO(synk): only p == 2 and p == inf are implemented for
    #             utils.adversarial_distance; general fractional p is not.
    p_is_inf = (p == float("inf"))

    kernel = functools.partial(_best_sample_kernel, bool(targeted),
                               bool(p_is_inf), k, n, tile_n, nb)

    def row_spec(shape):
        return pl.BlockSpec(shape, lambda i: (i, 0))

    out_shapes = (
        jax.ShapeDtypeStruct((n, k_pad), jnp.float32),  # padded class scores
        jax.ShapeDtypeStruct((n, d), jnp.float32),      # new best (aliased)
        jax.ShapeDtypeStruct((n, 1), jnp.float32),      # new best_distances
        jax.ShapeDtypeStruct((n, 1), jnp.int32),        # new found_adversarial
    )

    cost = pl.CostEstimate(
        flops=2 * n * d * k_pad + 6 * n * d,
        transcendentals=0,
        bytes_accessed=(3 * n * d + d * k_pad + n * k_pad + 6 * n) * 4,
    )

    scores, new_best, new_bd, new_found = pl.pallas_call(
        kernel,
        out_shape=out_shapes,
        grid=(nb,),
        in_specs=[
            row_spec((tile_n, d)),                                # x (streamed)
            pl.BlockSpec(memory_space=pltpu.MemorySpace.VMEM),    # W resident, 1 copy
            pl.BlockSpec(memory_space=pltpu.MemorySpace.VMEM),    # b resident
            row_spec((tile_n, d)),                                # genuines (streamed)
            row_spec((tile_n, 1)),                                # labels
            row_spec((tile_n, 1)),                                # best_distances
            row_spec((tile_n, 1)),                                # found_adversarial
            pl.BlockSpec(memory_space=pl.ANY),                    # best (raw HBM)
        ],
        out_specs=(
            row_spec((tile_n, k_pad)),
            pl.BlockSpec(memory_space=pl.ANY),                    # new best (raw HBM)
            row_spec((tile_n, 1)),
            row_spec((tile_n, 1)),
        ),
        scratch_shapes=[
            pltpu.VMEM((tile_n, d), jnp.float32),                 # blend buffer
            pltpu.VMEM((1, 1), jnp.float32),                      # any-replace flag
            pltpu.SemaphoreType.DMA(()),
        ],
        input_output_aliases={5: 2, 6: 3, 7: 1},                  # in-place tracker
        compiler_params=pltpu.CompilerParams(
            dimension_semantics=("parallel",),
            vmem_limit_bytes=vmem_limit),
        cost_estimate=cost,
    )(x2, w2, b2, gen2, labels2, bestd2, found2, best2)

    return (scores[:, :k],
            new_best.reshape(x_nchw.shape),
            new_bd[:, 0],
            new_found[:, 0].astype(jnp.bool_))


def _reference(x_nchw, w, b, genuines_nchw, labels, best_nchw,
               best_distances, found_adversarial, *, targeted, p):
    n = x_nchw.shape[0]
    d = int(np.prod(x_nchw.shape[1:]))
    x = x_nchw.reshape(n, d).astype(jnp.float32)
    gen = genuines_nchw.reshape(n, d).astype(jnp.float32)
    best = best_nchw.reshape(n, d).astype(jnp.float32)
    outputs = x @ w + b
    pred = jnp.argmax(outputs, axis=1)
    successful = (pred == labels) if targeted else (pred != labels)
    diff = x - gen
    if p == float("inf"):
        dist = jnp.max(jnp.abs(diff), axis=1)
    else:
        dist = jnp.sqrt(jnp.sum(diff * diff, axis=1))
    better = dist < best_distances
    replace = successful & (better | ~found_adversarial)
    new_best = jnp.where(replace[:, None], x, best).reshape(x_nchw.shape)
    new_bd = jnp.where(replace, dist, best_distances)
    new_found = found_adversarial | replace
    return outputs, new_best, new_bd, new_found


if __name__ == "__main__":
    key = jax.random.PRNGKey(0)
    N, C, H, Wd = 2, 4, 16, 16
    K = 8
    D = C * H * Wd

    k1, k2, k3, k4, k5 = jax.random.split(key, 5)
    x = jax.random.normal(k1, (N, C, H, Wd), jnp.float32)          # adversarial candidates
    genuines = jax.random.normal(k2, (N, C, H, Wd), jnp.float32)   # tracker.genuines
    w = 0.05 * jax.random.normal(k3, (D, K), jnp.float32)          # linear "model" weights
    b = 0.10 * jax.random.normal(k4, (K,), jnp.float32)            # linear "model" bias
    labels = jax.random.randint(k5, (N,), 0, K, jnp.int32)         # tracker.labels

    best = genuines                                                # tracker.best
    fwd = jax.jit(best_sample_forward, static_argnames=("targeted", "p"))

    def check(targeted, p, bd, fo):
        res = jax.block_until_ready(
            fwd(x, w, b, genuines, labels, best, bd, fo, targeted=targeted, p=p))
        ref = _reference(x, w, b, genuines, labels, best, bd, fo,
                         targeted=targeted, p=p)
        np.testing.assert_allclose(np.asarray(res[0]), np.asarray(ref[0]),
                                   rtol=1e-5, atol=1e-5)
        np.testing.assert_allclose(np.asarray(res[1]), np.asarray(ref[1]),
                                   rtol=1e-5, atol=1e-5)
        np.testing.assert_allclose(np.asarray(res[2]), np.asarray(ref[2]),
                                   rtol=1e-5, atol=1e-5)
        np.testing.assert_array_equal(np.asarray(res[3]), np.asarray(ref[3]))

    # Fresh tracker (no adversarial found yet) -> replacement/DMA path exercised.
    check(False, 2.0,
          jnp.full((N,), jnp.inf, jnp.float32), jnp.zeros((N,), jnp.bool_))
    # Unbeatable existing best -> no replacement; aliased best must pass through.
    check(False, 2.0,
          jnp.zeros((N,), jnp.float32), jnp.ones((N,), jnp.bool_))
    # L-inf distance variant.
    check(False, float("inf"),
          jnp.full((N,), jnp.inf, jnp.float32), jnp.zeros((N,), jnp.bool_))

    print("KERNEL_OK")
</pallas_src>

<mosaic_0001>
module attributes {stable_mosaic.version = 11 : i64} {
  func.func @_best_sample_kernel(%arg0: i32, %arg1: memref<2x1024xf32, #tpu.memory_space<vmem>>, %arg2: memref<1024x128xf32, #tpu.memory_space<vmem>>, %arg3: memref<1x128xf32, #tpu.memory_space<vmem>>, %arg4: memref<2x1024xf32, #tpu.memory_space<vmem>>, %arg5: memref<2x1xi32, #tpu.memory_space<vmem>>, %arg6: memref<2x1xf32, #tpu.memory_space<vmem>>, %arg7: memref<2x1xi32, #tpu.memory_space<vmem>>, %arg8: memref<2x1024xf32, #tpu.memory_space<any>>, %arg9: memref<2x128xf32, #tpu.memory_space<vmem>>, %arg10: memref<2x1024xf32, #tpu.memory_space<any>>, %arg11: memref<2x1xf32, #tpu.memory_space<vmem>>, %arg12: memref<2x1xi32, #tpu.memory_space<vmem>>, %arg13: memref<2x1024xf32, #tpu.memory_space<vmem>>, %arg14: memref<1x1xf32, #tpu.memory_space<vmem>>, %arg15: memref<!tpu.dma_semaphore, #tpu.memory_space<semaphore_mem>>) attributes {dimension_semantics = [#tpu.dimension_semantics<parallel>], iteration_bounds = array<i64: 1>, scalar_prefetch = 0 : i64, scratch_operands = 3 : i64, tpu.core_type = #tpu.core_type<tc>, window_params = [{transform_indices = @transform_0, window_bounds = array<i64: 2, 1024>}, {pipeline_mode = #tpu.pipeline_mode<synchronous>, transform_indices = @transform_1, window_bounds = array<i64: 1024, 128>}, {pipeline_mode = #tpu.pipeline_mode<synchronous>, transform_indices = @transform_2, window_bounds = array<i64: 1, 128>}, {transform_indices = @transform_3, window_bounds = array<i64: 2, 1024>}, {transform_indices = @transform_4, window_bounds = array<i64: 2, 1>}, {transform_indices = @transform_5, window_bounds = array<i64: 2, 1>}, {transform_indices = @transform_6, window_bounds = array<i64: 2, 1>}, {}, {transform_indices = @transform_8, window_bounds = array<i64: 2, 128>}, {}, {transform_indices = @transform_10, window_bounds = array<i64: 2, 1>}, {transform_indices = @transform_11, window_bounds = array<i64: 2, 1>}]} {
    %c0 = arith.constant 0 : index
    %c0_0 = arith.constant 0 : index
    %0 = vector.load %arg1[%c0, %c0_0] : memref<2x1024xf32, #tpu.memory_space<vmem>>, vector<2x1024xf32>
    %c0_1 = arith.constant 0 : index
    %c0_2 = arith.constant 0 : index
    %1 = vector.load %arg2[%c0_1, %c0_2] : memref<1024x128xf32, #tpu.memory_space<vmem>>, vector<1024x128xf32>
    %cst = arith.constant dense<0.000000e+00> : vector<2x128xf32>
    %2 = tpu.matmul %0, %1, %cst {dimension_numbers = #tpu.dot_dimension_numbers<[1], [0], [0], [1], [0, 0, 1, 1], [], []>} : vector<2x1024xf32>, vector<1024x128xf32>, vector<2x128xf32> -> vector<2x128xf32>
    %c0_3 = arith.constant 0 : index
    %c0_4 = arith.constant 0 : index
    %3 = vector.load %arg3[%c0_3, %c0_4] : memref<1x128xf32, #tpu.memory_space<vmem>>, vector<1x128xf32>
    %4 = vector.broadcast %3 : vector<1x128xf32> to vector<2x128xf32>
    %5 = arith.addf %2, %4 : vector<2x128xf32>
    %c0_5 = arith.constant 0 : index
    %c0_6 = arith.constant 0 : index
    %6 = vector.load %arg9[%c0_5, %c0_6] : memref<2x128xf32, #tpu.memory_space<vmem>>, vector<2x128xf32>
    tpu.vector_store %arg9[%c0_5, %c0_6], %5 {strides = array<i32>} : memref<2x128xf32, #tpu.memory_space<vmem>>, vector<2x128xf32>,
    %7 = tpu.iota {dimensions = array<i32: 1>} : vector<2x128xi32>
    %c8_i32 = arith.constant 8 : i32
    %8 = vector.broadcast %c8_i32 : i32 to vector<2x128xi32>
    %9 = arith.cmpi slt, %7, %8 : vector<2x128xi32>
    %cst_7 = arith.constant 0xFF800000 : f32
    %10 = vector.broadcast %cst_7 : f32 to vector<2x128xf32>
    %11 = arith.select %9, %5, %10 : vector<2x128xi1>, vector<2x128xf32>
    %cst_8 = arith.constant dense<0xFF800000> : vector<2xf32>
    %12 = vector.multi_reduction <maximumf>, %11, %cst_8 [1] : vector<2x128xf32> to vector<2xf32>
    %13 = vector.shape_cast %12 : vector<2xf32> to vector<2x1xf32>
    %14 = vector.broadcast %13 : vector<2x1xf32> to vector<2x128xf32>
    %15 = arith.cmpf oge, %11, %14 : vector<2x128xf32>
    %c128_i32 = arith.constant 128 : i32
    %16 = vector.broadcast %c128_i32 : i32 to vector<2x128xi32>
    %17 = arith.select %15, %7, %16 : vector<2x128xi1>, vector<2x128xi32>
    %cst_9 = arith.constant dense<2147483647> : vector<2xi32>
    %18 = vector.multi_reduction <minsi>, %17, %cst_9 [1] : vector<2x128xi32> to vector<2xi32>
    %19 = vector.shape_cast %18 : vector<2xi32> to vector<2x1xi32>
    %c0_10 = arith.constant 0 : index
    %c0_11 = arith.constant 0 : index
    %20 = vector.load %arg5[%c0_10, %c0_11] : memref<2x1xi32, #tpu.memory_space<vmem>>, vector<2x1xi32>
    %21 = arith.cmpi ne, %19, %20 : vector<2x1xi32>
    %c0_12 = arith.constant 0 : index
    %c0_13 = arith.constant 0 : index
    %22 = vector.load %arg4[%c0_12, %c0_13] : memref<2x1024xf32, #tpu.memory_space<vmem>>, vector<2x1024xf32>
    %23 = arith.subf %0, %22 : vector<2x1024xf32>
    %24 = arith.mulf %23, %23 : vector<2x1024xf32>
    %cst_14 = arith.constant dense<0.000000e+00> : vector<2xf32>
    %25 = vector.multi_reduction <add>, %24, %cst_14 [1] : vector<2x1024xf32> to vector<2xf32>
    %26 = vector.shape_cast %25 : vector<2xf32> to vector<2x1xf32>
    %27 = math.sqrt %26 : vector<2x1xf32>
    %c0_15 = arith.constant 0 : index
    %c0_16 = arith.constant 0 : index
    %28 = vector.load %arg6[%c0_15, %c0_16] : memref<2x1xf32, #tpu.memory_space<vmem>>, vector<2x1xf32>
    %c0_17 = arith.constant 0 : index
    %c0_18 = arith.constant 0 : index
    %29 = vector.load %arg7[%c0_17, %c0_18] : memref<2x1xi32, #tpu.memory_space<vmem>>, vector<2x1xi32>
    %c0_i32 = arith.constant 0 : i32
    %30 = vector.broadcast %c0_i32 : i32 to vector<2x1xi32>
    %31 = arith.cmpi ne, %29, %30 : vector<2x1xi32>
    %32 = arith.cmpf olt, %27, %28 : vector<2x1xf32>
    %cst_19 = arith.constant dense<true> : vector<2x1xi1>
    %33 = arith.xori %31, %cst_19 : vector<2x1xi1>
    %34 = arith.ori %32, %33 : vector<2x1xi1>
    %35 = arith.andi %21, %34 : vector<2x1xi1>
    %36 = tpu.iota {dimensions = array<i32: 0>} : vector<2x1xi32>
    %c2_i32 = arith.constant 2 : i32
    %37 = arith.muli %arg0, %c2_i32 : i32
    %38 = vector.broadcast %37 : i32 to vector<2x1xi32>
    %39 = arith.addi %36, %38 : vector<2x1xi32>
    %c2_i32_20 = arith.constant 2 : i32
    %40 = vector.broadcast %c2_i32_20 : i32 to vector<2x1xi32>
    %41 = arith.cmpi slt, %39, %40 : vector<2x1xi32>
    %42 = arith.andi %35, %41 : vector<2x1xi1>
    %43 = arith.select %42, %27, %28 : vector<2x1xi1>, vector<2x1xf32>
    %c0_21 = arith.constant 0 : index
    %c0_22 = arith.constant 0 : index
    %44 = vector.load %arg11[%c0_21, %c0_22] : memref<2x1xf32, #tpu.memory_space<vmem>>, vector<2x1xf32>
    tpu.vector_store %arg11[%c0_21, %c0_22], %43 {strides = array<i32>} : memref<2x1xf32, #tpu.memory_space<vmem>>, vector<2x1xf32>,
    %45 = arith.ori %31, %42 : vector<2x1xi1>
    %46 = arith.extui %45 : vector<2x1xi1> to vector<2x1xi32>
    %c0_23 = arith.constant 0 : index
    %c0_24 = arith.constant 0 : index
    %47 = vector.load %arg12[%c0_23, %c0_24] : memref<2x1xi32, #tpu.memory_space<vmem>>, vector<2x1xi32>
    tpu.vector_store %arg12[%c0_23, %c0_24], %46 {strides = array<i32>} : memref<2x1xi32, #tpu.memory_space<vmem>>, vector<2x1xi32>,
    %48 = arith.extui %42 : vector<2x1xi1> to vector<2x1xi32>
    %49 = arith.sitofp %48 : vector<2x1xi32> to vector<2x1xf32>
    %cst_25 = arith.constant dense<0xFF800000> : vector<1xf32>
    %50 = vector.multi_reduction <maximumf>, %49, %cst_25 [0] : vector<2x1xf32> to vector<1xf32>
    %51 = vector.shape_cast %50 : vector<1xf32> to vector<1x1xf32>
    %c0_26 = arith.constant 0 : index
    %c0_27 = arith.constant 0 : index
    %52 = vector.load %arg14[%c0_26, %c0_27] : memref<1x1xf32, #tpu.memory_space<vmem>>, vector<1x1xf32>
    tpu.vector_store %arg14[%c0_26, %c0_27], %51 {strides = array<i32>} : memref<1x1xf32, #tpu.memory_space<vmem>>, vector<1x1xf32>,
    %c0_28 = arith.constant 0 : index
    %c0_29 = arith.constant 0 : index
    %53 = vector.load %arg14[%c0_28, %c0_29] : memref<1x1xf32, #tpu.memory_space<vmem>>, vector<1x1xf32>
    %54 = vector.extract %53[0, 0] : f32 from vector<1x1xf32>
    %cst_30 = arith.constant 0.000000e+00 : f32
    %55 = arith.cmpf ogt, %54, %cst_30 : f32
    %c2_i32_31 = arith.constant 2 : i32
    %56 = arith.muli %arg0, %c2_i32_31 : i32
    %57 = arith.extui %55 : i1 to i32
    %c0_i32_32 = arith.constant 0 : i32
    %58 = arith.cmpi ne, %57, %c0_i32_32 : i32
    scf.if %58 {
      %c0_i32_33 = arith.constant 0 : i32
      %59 = tpu.memref_slice %arg8[%56, %c0_i32_33] : memref<2x1024xf32, #tpu.memory_space<any>> -> memref<2x1024xf32, #tpu.memory_space<any>>
      %c0_i32_34 = arith.constant 0 : i32
      %c0_i32_35 = arith.constant 0 : i32
      %60 = tpu.memref_slice %arg13[%c0_i32_34, %c0_i32_35] : memref<2x1024xf32, #tpu.memory_space<vmem>> -> memref<2x1024xf32, #tpu.memory_space<vmem>>
      tpu.enqueue_dma source(%59 : memref<2x1024xf32, #tpu.memory_space<any>>) target(%60 : memref<2x1024xf32, #tpu.memory_space<vmem>>) target_semaphore(%arg15 : memref<!tpu.dma_semaphore, #tpu.memory_space<semaphore_mem>>)
      %c0_i32_36 = arith.constant 0 : i32
      %61 = tpu.memref_slice %arg8[%56, %c0_i32_36] : memref<2x1024xf32, #tpu.memory_space<any>> -> memref<2x1024xf32, #tpu.memory_space<any>>
      %c0_i32_37 = arith.constant 0 : i32
      %c0_i32_38 = arith.constant 0 : i32
      %62 = tpu.memref_slice %arg13[%c0_i32_37, %c0_i32_38] : memref<2x1024xf32, #tpu.memory_space<vmem>> -> memref<2x1024xf32, #tpu.memory_space<vmem>>
      tpu.wait_dma2 semaphore(%arg15 : memref<!tpu.dma_semaphore, #tpu.memory_space<semaphore_mem>>) src(%61 : memref<2x1024xf32, #tpu.memory_space<any>>) dst(%62 : memref<2x1024xf32, #tpu.memory_space<vmem>>)
      %c0_39 = arith.constant 0 : index
      %c0_40 = arith.constant 0 : index
      %63 = vector.load %arg13[%c0_39, %c0_40] : memref<2x1024xf32, #tpu.memory_space<vmem>>, vector<2x1024xf32>
      %64 = vector.shape_cast %42 : vector<2x1xi1> to vector<2x1xi1>
      %65 = vector.broadcast %64 : vector<2x1xi1> to vector<2x1024xi1>
      %66 = arith.select %65, %0, %63 : vector<2x1024xi1>, vector<2x1024xf32>
      %c0_41 = arith.constant 0 : index
      %c0_42 = arith.constant 0 : index
      %67 = vector.load %arg13[%c0_41, %c0_42] : memref<2x1024xf32, #tpu.memory_space<vmem>>, vector<2x1024xf32>
      tpu.vector_store %arg13[%c0_41, %c0_42], %66 {strides = array<i32>} : memref<2x1024xf32, #tpu.memory_space<vmem>>, vector<2x1024xf32>,
      %c0_i32_43 = arith.constant 0 : i32
      %c0_i32_44 = arith.constant 0 : i32
      %68 = tpu.memref_slice %arg13[%c0_i32_43, %c0_i32_44] : memref<2x1024xf32, #tpu.memory_space<vmem>> -> memref<2x1024xf32, #tpu.memory_space<vmem>>
      %c0_i32_45 = arith.constant 0 : i32
      %69 = tpu.memref_slice %arg10[%56, %c0_i32_45] : memref<2x1024xf32, #tpu.memory_space<any>> -> memref<2x1024xf32, #tpu.memory_space<any>>
      tpu.enqueue_dma source(%68 : memref<2x1024xf32, #tpu.memory_space<vmem>>) target(%69 : memref<2x1024xf32, #tpu.memory_space<any>>) target_semaphore(%arg15 : memref<!tpu.dma_semaphore, #tpu.memory_space<semaphore_mem>>)
      %c0_i32_46 = arith.constant 0 : i32
      %c0_i32_47 = arith.constant 0 : i32
      %70 = tpu.memref_slice %arg13[%c0_i32_46, %c0_i32_47] : memref<2x1024xf32, #tpu.memory_space<vmem>> -> memref<2x1024xf32, #tpu.memory_space<vmem>>
      %c0_i32_48 = arith.constant 0 : i32
      %71 = tpu.memref_slice %arg10[%56, %c0_i32_48] : memref<2x1024xf32, #tpu.memory_space<any>> -> memref<2x1024xf32, #tpu.memory_space<any>>
      tpu.wait_dma2 semaphore(%arg15 : memref<!tpu.dma_semaphore, #tpu.memory_space<semaphore_mem>>) src(%70 : memref<2x1024xf32, #tpu.memory_space<vmem>>) dst(%71 : memref<2x1024xf32, #tpu.memory_space<any>>)
    } else {
    }
    return
  }
  func.func @transform_0(%arg0: i32) -> (i32, i32) {
    %c0_i32 = arith.constant 0 : i32
    %c0_i32_0 = arith.constant 0 : i32
    return %arg0, %c0_i32 : i32, i32
  }
  func.func @transform_1(%arg0: i32) -> (i32, i32) {
    %c0_i32 = arith.constant 0 : i32
    %c0_i32_0 = arith.constant 0 : i32
    %c0_i32_1 = arith.constant 0 : i32
    return %c0_i32, %c0_i32_0 : i32, i32
  }
  func.func @transform_2(%arg0: i32) -> (i32, i32) {
    %c0_i32 = arith.constant 0 : i32
    %c0_i32_0 = arith.constant 0 : i32
    %c0_i32_1 = arith.constant 0 : i32
    return %c0_i32, %c0_i32_0 : i32, i32
  }
  func.func @transform_3(%arg0: i32) -> (i32, i32) {
    %c0_i32 = arith.constant 0 : i32
    %c0_i32_0 = arith.constant 0 : i32
    return %arg0, %c0_i32 : i32, i32
  }
  func.func @transform_4(%arg0: i32) -> (i32, i32) {
    %c0_i32 = arith.constant 0 : i32
    %c0_i32_0 = arith.constant 0 : i32
    return %arg0, %c0_i32 : i32, i32
  }
  func.func @transform_5(%arg0: i32) -> (i32, i32) {
    %c0_i32 = arith.constant 0 : i32
    %c0_i32_0 = arith.constant 0 : i32
    return %arg0, %c0_i32 : i32, i32
  }
  func.func @transform_6(%arg0: i32) -> (i32, i32) {
    %c0_i32 = arith.constant 0 : i32
    %c0_i32_0 = arith.constant 0 : i32
    return %arg0, %c0_i32 : i32, i32
  }
  func.func @transform_8(%arg0: i32) -> (i32, i32) {
    %c0_i32 = arith.constant 0 : i32
    %c0_i32_0 = arith.constant 0 : i32
    return %arg0, %c0_i32 : i32, i32
  }
  func.func @transform_10(%arg0: i32) -> (i32, i32) {
    %c0_i32 = arith.constant 0 : i32
    %c0_i32_0 = arith.constant 0 : i32
    return %arg0, %c0_i32 : i32, i32
  }
  func.func @transform_11(%arg0: i32) -> (i32, i32) {
    %c0_i32 = arith.constant 0 : i32
    %c0_i32_0 = arith.constant 0 : i32
    return %arg0, %c0_i32 : i32, i32
  }
}

</mosaic_0001>

<bundles_post_ra>
// kernel: best_sample_forward.1
= control target key start
LH: loop header
LB: loop body
LE: loop exit
PB: predicated region body
PF: predicated region fallthrough
CT: control target
= control target key end

     0   :  { %17 = vsyncpa [#allocation6], 0  ;;  %v1069_v30 = vmov 1983009808   ;;  %v175_v32 = vlaneseq  ;;  %vm498_vm1 = vcmask 1041408   ;;  %vm1070_vm8 = vmmov 1   ;;  %s1652_s0 = inlined_call_operand.vmem [shape: f32[2,1024], index: 0, kind: input, shape index: {}]   ;;  %s1653_s1 = inlined_call_operand.vmem [shape: f32[1024,128], index: 1, kind: input, shape index: {}]   ;;  %s1654_s2 = inlined_call_operand.vmem [shape: f32[1,128], index: 2, kind: input, shape index: {}]   ;;  %s1655_s3 = inlined_call_operand.vmem [shape: f32[2,1024], index: 3, kind: input, shape index: {}]   ;;  %s1656_s4 = inlined_call_operand.vmem [shape: s32[2,1], index: 4, kind: input, shape index: {}]   ;;  %s1657_s5 = inlined_call_operand.vmem [shape: f32[2,1], index: 5, kind: input, shape index: {}, may-alias: {5,10}]   ;;  %s1658_s6 = inlined_call_operand.vmem [shape: s32[2,1], index: 6, kind: input, shape index: {}, may-alias: {6,11}]   ;;  %s1659_s7 = inlined_call_operand.vmem [shape: f32[2,1024], index: 7, kind: input, shape index: {}, may-alias: {7,9}]   ;;  %s1660_s8 = inlined_call_operand.hbm [shape: f32[2,128], index: 8, kind: output, shape index: {0}]   ;;  %s1661_s9 = inlined_call_operand.vmem [shape: f32[2,1024], index: 9, kind: output, shape index: {1}, may-alias: {7,9}]   ;;  %s1662_s10 = inlined_call_operand.vmem [shape: f32[2,1], index: 10, kind: output, shape index: {2}, may-alias: {5,10}]   ;;  %s1663_s11 = inlined_call_operand.vmem [shape: s32[2,1], index: 11, kind: output, shape index: {3}, may-alias: {6,11}]  }
   0x1   :  { %v65_v0 = vld [vmem:[%s1653_s1 + $0xf8] sm:$0xff]  ;;  %v64_v4 = vld [vmem:[%s1653_s1 + $0xf0] sm:$0xff]  ;;  %v63_v8 = vld [vmem:[%s1653_s1 + $0xe8] sm:$0xff]  ;;  %v173_v31 = vunpack.c.l.s4 %v1069_v30  ;;  %vm610_vm13 = vcmask 1024  }
   0x2   :  { %v97_v1 = vld [vmem:[%s1653_s1 + $0x1f8] sm:$0xff]  ;;  %890 = vmatprep.subr.mxu0 %v65_v0  ;;  %v96_v5 = vld [vmem:[%s1653_s1 + $0x1f0] sm:$0xff]  ;;  %v95_v9 = vld [vmem:[%s1653_s1 + $0x1e8] sm:$0xff]  ;;  %v1250_v42 = vshrl.u32 %v175_v32, 7 }
   0x3   :  { %925 = vmatprep.subr.mxu1 %v97_v1  ;;  %v49_v2 = vld [vmem:[%s1653_s1 + $0x78] sm:$0xff]  ;;  %v48_v6 = vld [vmem:[%s1653_s1 + $0x70] sm:$0xff]  ;;  %v47_v10 = vld [vmem:[%s1653_s1 + $0x68] sm:$0xff]  ;;  %v174_v41 = vunpack.c.0.s8 %v173_v31 }
   0x4   :  { %v81_v3 = vld [vmem:[%s1653_s1 + $0x178] sm:$0xff]  ;;  %891 = vmatpush3.msra.mxu0 %v49_v2  ;;  %v80_v7 = vld [vmem:[%s1653_s1 + $0x170] sm:$0xff]  ;;  %v79_v11 = vld [vmem:[%s1653_s1 + $0x168] sm:$0xff]  ;;  %vm607_vm10 = vcmp.lt.s32.totalorder %v1250_v42, 2 }
   0x5   :  { %926 = vmatpush3.msra.mxu1 %v81_v3  ;;  %892 = vmatprep.subr.mxu0 %v64_v4  ;;  %v62_v12 = vld [vmem:[%s1653_s1 + $0xe0] sm:$0xff]  ;;  %v61_v16 = vld [vmem:[%s1653_s1 + $0xd8] sm:$0xff]  ;;  %v60_v20 = vld [vmem:[%s1653_s1 + $0xd0] sm:$0xff]  ;;  %v1277_v51 = vsub.s32 %v174_v41, %v1250_v42 }
   0x6   :  { %927 = vmatprep.subr.mxu1 %v96_v5  ;;  %893 = vmatpush3.msra.mxu0 %v48_v6  ;;  %v94_v13 = vld [vmem:[%s1653_s1 + $0x1e0] sm:$0xff]  ;;  %v93_v17 = vld [vmem:[%s1653_s1 + $0x1d8] sm:$0xff]  ;;  %v92_v21 = vld [vmem:[%s1653_s1 + $0x1d0] sm:$0xff] }
   0x7   :  { %928 = vmatpush3.msra.mxu1 %v80_v7  ;;  %894 = vmatprep.subr.mxu0 %v63_v8  ;;  %v46_v14 = vld [vmem:[%s1653_s1 + $0x60] sm:$0xff]  ;;  %v45_v18 = vld [vmem:[%s1653_s1 + $0x58] sm:$0xff]  ;;  %v44_v22 = vld [vmem:[%s1653_s1 + $0x50] sm:$0xff] }
   0x8   :  { %929 = vmatprep.subr.mxu1 %v95_v9  ;;  %v78_v15 = vld [vmem:[%s1653_s1 + $0x160] sm:$0xff]  ;;  %895 = vmatpush3.msra.mxu0 %v47_v10  ;;  %v77_v19 = vld [vmem:[%s1653_s1 + $0x158] sm:$0xff]  ;;  %v76_v23 = vld [vmem:[%s1653_s1 + $0x150] sm:$0xff] }
   0x9   :  { %930 = vmatpush3.msra.mxu1 %v79_v11  ;;  %896 = vmatprep.subr.mxu0 %v62_v12  ;;  %v59_v24 = vld [vmem:[%s1653_s1 + $0xc8] sm:$0xff]  ;;  %v58_v28 = vld [vmem:[%s1653_s1 + $0xc0] sm:$0xff]  ;;  %v57_v35 = vld [vmem:[%s1653_s1 + $0xb8] sm:$0xff] }
   0xa   :  { %931 = vmatprep.subr.mxu1 %v94_v13  ;;  %897 = vmatpush3.msra.mxu0 %v46_v14  ;;  %v91_v25 = vld [vmem:[%s1653_s1 + $0x1c8] sm:$0xff]  ;;  %v90_v29 = vld [vmem:[%s1653_s1 + $0x1c0] sm:$0xff]  ;;  %v89_v36 = vld [vmem:[%s1653_s1 + $0x1b8] sm:$0xff] }
   0xb   :  { %932 = vmatpush3.msra.mxu1 %v78_v15  ;;  %898 = vmatprep.subr.mxu0 %v61_v16  ;;  %v43_v26 = vld [vmem:[%s1653_s1 + $0x48] sm:$0xff]  ;;  %v42_v33 = vld [vmem:[%s1653_s1 + $0x40] sm:$0xff]  ;;  %v41_v37 = vld [vmem:[%s1653_s1 + $0x38] sm:$0xff] }
   0xc   :  { %933 = vmatprep.subr.mxu1 %v93_v17  ;;  %899 = vmatpush3.msra.mxu0 %v45_v18  ;;  %v75_v27 = vld [vmem:[%s1653_s1 + $0x148] sm:$0xff]  ;;  %v74_v34 = vld [vmem:[%s1653_s1 + $0x140] sm:$0xff]  ;;  %v73_v38 = vld [vmem:[%s1653_s1 + $0x138] sm:$0xff] }
   0xd   :  { %934 = vmatpush3.msra.mxu1 %v77_v19  ;;  %900 = vmatprep.subr.mxu0 %v60_v20  ;;  %v56_v39 = vld [vmem:[%s1653_s1 + $0xb0] sm:$0xff]  ;;  %v55_v45 = vld [vmem:[%s1653_s1 + $0xa8] sm:$0xff]  ;;  %v54_v49 = vld [vmem:[%s1653_s1 + $0xa0] sm:$0xff] }
   0xe   :  { %935 = vmatprep.subr.mxu1 %v92_v21  ;;  %901 = vmatpush3.msra.mxu0 %v44_v22  ;;  %v88_v40 = vld [vmem:[%s1653_s1 + $0x1b0] sm:$0xff]  ;;  %v87_v46 = vld [vmem:[%s1653_s1 + $0x1a8] sm:$0xff]  ;;  %v86_v50 = vld [vmem:[%s1653_s1 + $0x1a0] sm:$0xff] }
   0xf   :  { %936 = vmatpush3.msra.mxu1 %v76_v23  ;;  %902 = vmatprep.subr.mxu0 %v59_v24  ;;  %v40_v43 = vld [vmem:[%s1653_s1 + $0x30] sm:$0xff]  ;;  %v39_v47 = vld [vmem:[%s1653_s1 + $0x28] sm:$0xff]  ;;  %v38_v52 = vld [vmem:[%s1653_s1 + $0x20] sm:$0xff] }
  0x10   :  { %937 = vmatprep.subr.mxu1 %v91_v25  ;;  %903 = vmatpush3.msra.mxu0 %v43_v26  ;;  %v72_v44 = vld [vmem:[%s1653_s1 + $0x130] sm:$0xff]  ;;  %v71_v48 = vld [vmem:[%s1653_s1 + $0x128] sm:$0xff]  ;;  %v70_v53 = vld [vmem:[%s1653_s1 + $0x120] sm:$0xff] }
  0x11   :  { %938 = vmatpush3.msra.mxu1 %v75_v27  ;;  %904 = vmatprep.subr.mxu0 %v58_v28  ;;  %v1288_v54 = vld [vmem:[%s1652_s0] sm:$0xff]  ;;  %v53_v55 = vld [vmem:[%s1653_s1 + $0x98] sm:$0xff]  ;;  %v52_v60 = vld [vmem:[%s1653_s1 + $0x90] sm:$0xff] }
  0x12   :  { %939 = vmatprep.subr.mxu1 %v90_v29  ;;  %905 = vmatpush3.msra.mxu0 %v42_v33  ;;  %v85_v56 = vld [vmem:[%s1653_s1 + $0x198] sm:$0xff]  ;;  %v171_v57 = vcombine.high %v1288_v54, %v1288_v54  ;;  %v84_v61 = vld [vmem:[%s1653_s1 + $0x190] sm:$0xff]  ;;  %v1312_v62 = vrot.slane %v1288_v54, %v1277_v51  ;;  %v51_v1 = vld [vmem:[%s1653_s1 + $0x88] sm:$0xff] }
  0x13   :  { %940 = vmatpush3.msra.mxu1 %v74_v34  ;;  %906 = vmatprep.subr.mxu0 %v57_v35  ;;  %v37_v58 = vld [vmem:[%s1653_s1 + $0x18] sm:$0xff]  ;;  %v36_v63 = vld [vmem:[%s1653_s1 + $0x10] sm:$0xff]  ;;  %v83_v2 = vld [vmem:[%s1653_s1 + $0x188] sm:$0xff] }
  0x14   :  { %941 = vmatprep.subr.mxu1 %v89_v36  ;;  %907 = vmatpush3.msra.mxu0 %v41_v37  ;;  %v69_v59 = vld [vmem:[%s1653_s1 + $0x118] sm:$0xff]  ;;  %v68_v0 = vld [vmem:[%s1653_s1 + $0x110] sm:$0xff]  ;;  %v1327_v3 = vrot.slane %v171_v57, %v1277_v51  ;;  %v35_v4 = vld [vmem:[%s1653_s1 + $0x8] sm:$0xff]  ;;  %v1343_v8 = vcombine.high %v1312_v62, %v1312_v62 }
  0x15   :  { %942 = vmatpush3.msra.mxu1 %v73_v38  ;;  %908 = vmatprep.subr.mxu0 %v56_v39  ;;  %v67_v5 = vld [vmem:[%s1653_s1 + $0x108] sm:$0xff]  ;;  %v50_v6 = vld [vmem:[%s1653_s1 + $0x80] sm:$0xff]  ;;  %v129_v12 = vld [vmem:[%s1653_s1 + $0x2f8] sm:$0xff] }
  0x16   :  { %943 = vmatprep.subr.mxu1 %v88_v40  ;;  %909 = vmatpush3.msra.mxu0 %v40_v43  ;;  %v82_v7 = vld [vmem:[%s1653_s1 + $0x180] sm:$0xff]  ;;  %v1353_v11 = vcombine.high %v1327_v3, %v1327_v3  ;;  %v161_v13 = vld [vmem:[%s1653_s1 + $0x3f8] sm:$0xff]  ;;  %v128_v16 = vld [vmem:[%s1653_s1 + $0x2f0] sm:$0xff] }
  0x17   :  { %944 = vmatpush3.msra.mxu1 %v72_v44  ;;  %910 = vmatprep.subr.mxu0 %v55_v45  ;;  %v34_v9 = vld [vmem:[%s1653_s1] sm:$0xff]  ;;  %v113_v14 = vld [vmem:[%s1653_s1 + $0x278] sm:$0xff]  ;;  %v160_v17 = vld [vmem:[%s1653_s1 + $0x3f0] sm:$0xff] }
  0x18   :  { %945 = vmatprep.subr.mxu1 %v87_v46  ;;  %911 = vmatpush3.msra.mxu0 %v39_v47  ;;  %v66_v10 = vld [vmem:[%s1653_s1 + $0x100] sm:$0xff]  ;;  %v145_v15 = vld [vmem:[%s1653_s1 + $0x378] sm:$0xff]  ;;  %v112_v18 = vld [vmem:[%s1653_s1 + $0x270] sm:$0xff] }
  0x19   :  { %946 = vmatpush3.msra.mxu1 %v71_v48  ;;  %912 = vmatprep.subr.mxu0 %v54_v49  ;;  %v144_v19 = vld [vmem:[%s1653_s1 + $0x370] sm:$0xff]  ;;  %v127_v20 = vld [vmem:[%s1653_s1 + $0x2e8] sm:$0xff]  ;;  %v126_v24 = vld [vmem:[%s1653_s1 + $0x2e0] sm:$0xff] }
  0x1a   :  { %947 = vmatprep.subr.mxu1 %v86_v50  ;;  %913 = vmatpush3.msra.mxu0 %v38_v52  ;;  %v159_v21 = vld [vmem:[%s1653_s1 + $0x3e8] sm:$0xff]  ;;  %v158_v25 = vld [vmem:[%s1653_s1 + $0x3e0] sm:$0xff]  ;;  %v125_v28 = vld [vmem:[%s1653_s1 + $0x2d8] sm:$0xff] }
  0x1b   :  { %948 = vmatpush3.msra.mxu1 %v70_v53  ;;  %914 = vmatprep.subr.mxu0 %v53_v55  ;;  %v111_v22 = vld [vmem:[%s1653_s1 + $0x268] sm:$0xff]  ;;  %v110_v26 = vld [vmem:[%s1653_s1 + $0x260] sm:$0xff]  ;;  %v157_v29 = vld [vmem:[%s1653_s1 + $0x3d8] sm:$0xff] }
  0x1c   :  { %949 = vmatprep.subr.mxu1 %v85_v56  ;;  %915 = vmatpush3.msra.mxu0 %v37_v58  ;;  %v143_v23 = vld [vmem:[%s1653_s1 + $0x368] sm:$0xff]  ;;  %v142_v27 = vld [vmem:[%s1653_s1 + $0x360] sm:$0xff]  ;;  %v109_v30 = vld [vmem:[%s1653_s1 + $0x258] sm:$0xff] }
  0x1d   :  { %950 = vmatpush3.msra.mxu1 %v69_v59  ;;  %916 = vmatprep.subr.mxu0 %v52_v60  ;;  %v141_v31 = vld [vmem:[%s1653_s1 + $0x358] sm:$0xff]  ;;  %v124_v33 = vld [vmem:[%s1653_s1 + $0x2d0] sm:$0xff]  ;;  %v123_v37 = vld [vmem:[%s1653_s1 + $0x2c8] sm:$0xff] }
  0x1e   :  { %951 = vmatprep.subr.mxu1 %v84_v61  ;;  %917 = vmatpush3.msra.mxu0 %v36_v63  ;;  %v156_v34 = vld [vmem:[%s1653_s1 + $0x3d0] sm:$0xff]  ;;  %v155_v38 = vld [vmem:[%s1653_s1 + $0x3c8] sm:$0xff]  ;;  %v122_v41 = vld [vmem:[%s1653_s1 + $0x2c0] sm:$0xff] }
  0x1f   :  { %952 = vmatpush3.msra.mxu1 %v68_v0  ;;  %918 = vmatprep.subr.mxu0 %v51_v1  ;;  %v108_v35 = vld [vmem:[%s1653_s1 + $0x250] sm:$0xff]  ;;  %v107_v39 = vld [vmem:[%s1653_s1 + $0x248] sm:$0xff]  ;;  %v154_v43 = vld [vmem:[%s1653_s1 + $0x3c0] sm:$0xff] }
  0x20   :  { %953 = vmatprep.subr.mxu1 %v83_v2  ;;  %919 = vmatpush3.msra.mxu0 %v35_v4  ;;  %v140_v36 = vld [vmem:[%s1653_s1 + $0x350] sm:$0xff]  ;;  %v139_v40 = vld [vmem:[%s1653_s1 + $0x348] sm:$0xff]  ;;  %v106_v44 = vld [vmem:[%s1653_s1 + $0x240] sm:$0xff] }
  0x21   :  { %954 = vmatpush3.msra.mxu1 %v67_v5  ;;  %920 = vmatprep.subr.mxu0 %v50_v6  ;;  %v138_v45 = vld [vmem:[%s1653_s1 + $0x340] sm:$0xff]  ;;  %v121_v46 = vld [vmem:[%s1653_s1 + $0x2b8] sm:$0xff]  ;;  %v120_v50 = vld [vmem:[%s1653_s1 + $0x2b0] sm:$0xff] }
  0x22   :  { %955 = vmatprep.subr.mxu1 %v82_v7  ;;  %921 = vmatpush3.msra.mxu0 %v34_v9  ;;  %v153_v47 = vld [vmem:[%s1653_s1 + $0x3b8] sm:$0xff]  ;;  %v152_v52 = vld [vmem:[%s1653_s1 + $0x3b0] sm:$0xff]  ;;  %v119_v56 = vld [vmem:[%s1653_s1 + $0x2a8] sm:$0xff] }
  0x23   :  { %277 = vmatprep.mubr.f32.mxu0 %v1343_v8  ;;  %956 = vmatpush3.msra.mxu1 %v66_v10  ;;  %v105_v48 = vld [vmem:[%s1653_s1 + $0x238] sm:$0xff]  ;;  %v104_v53 = vld [vmem:[%s1653_s1 + $0x230] sm:$0xff]  ;;  %v151_v57 = vld [vmem:[%s1653_s1 + $0x3a8] sm:$0xff] }
  0x24   :  { %278 = vmatmul.mubr.f32.vlgmr.msra.gmra.mxu0 %v1312_v62  ;;  %347 = vmatprep.mubr.f32.mxu1 %v1353_v11  ;;  %v137_v49 = vld [vmem:[%s1653_s1 + $0x338] sm:$0xff]  ;;  %v136_v55 = vld [vmem:[%s1653_s1 + $0x330] sm:$0xff]  ;;  %v1488_v58 = vld [vmem:[%s1652_s0 + $0x8] sm:$0xff] }
  0x25   :  { %960 = vmatprep.subr.mxu0 %v129_v12  ;;  %995 = vmatprep.subr.mxu1 %v161_v13  ;;  %v103_v59 = vld [vmem:[%s1653_s1 + $0x228] sm:$0xff]  ;;  %v118_v61 = vld [vmem:[%s1653_s1 + $0x2a0] sm:$0xff]  ;;  %v188_v2 = vcombine.high %v1488_v58, %v1488_v58  ;;  %v117_v4 = vld [vmem:[%s1653_s1 + $0x298] sm:$0xff]  ;;  %v1530_v12 = vrot.slane %v1488_v58, %v1277_v51 }
  0x26   :  { %348 = vmatmul.mubr.f32.vlgmr.msra.gmra.mxu1 %v1327_v3  ;;  %961 = vmatpush3.msra.mxu0 %v113_v14  ;;  %v135_v60 = vld [vmem:[%s1653_s1 + $0x328] sm:$0xff]  ;;  %v150_v63 = vld [vmem:[%s1653_s1 + $0x3a0] sm:$0xff]  ;;  %v149_v5 = vld [vmem:[%s1653_s1 + $0x398] sm:$0xff] }
  0x27   :  { %996 = vmatpush3.msra.mxu1 %v145_v15  ;;  %962 = vmatprep.subr.mxu0 %v128_v16  ;;  %v102_v0 = vld [vmem:[%s1653_s1 + $0x220] sm:$0xff]  ;;  %v101_v6 = vld [vmem:[%s1653_s1 + $0x218] sm:$0xff]  ;;  %v116_v9 = vld [vmem:[%s1653_s1 + $0x290] sm:$0xff]  ;;  %v1539_v15 = vrot.slane %v188_v2, %v1277_v51 }
  0x28   :  { %997 = vmatprep.subr.mxu1 %v160_v17  ;;  %963 = vmatpush3.msra.mxu0 %v112_v18  ;;  %v134_v1 = vld [vmem:[%s1653_s1 + $0x320] sm:$0xff]  ;;  %v133_v7 = vld [vmem:[%s1653_s1 + $0x318] sm:$0xff]  ;;  %v148_v10 = vld [vmem:[%s1653_s1 + $0x390] sm:$0xff] }
  0x29   :  { %998 = vmatpush3.msra.mxu1 %v144_v19  ;;  %964 = vmatprep.subr.mxu0 %v127_v20  ;;  %v100_v13 = vld [vmem:[%s1653_s1 + $0x210] sm:$0xff]  ;;  %v115_v16 = vld [vmem:[%s1653_s1 + $0x288] sm:$0xff]  ;;  %v114_v20 = vld [vmem:[%s1653_s1 + $0x280] sm:$0xff] }
  0x2a   :  { %999 = vmatprep.subr.mxu1 %v159_v21  ;;  %965 = vmatpush3.msra.mxu0 %v111_v22  ;;  %v132_v14 = vld [vmem:[%s1653_s1 + $0x310] sm:$0xff]  ;;  %v147_v17 = vld [vmem:[%s1653_s1 + $0x388] sm:$0xff]  ;;  %v146_v21 = vld [vmem:[%s1653_s1 + $0x380] sm:$0xff]  ;;  %v1561_v22 = vcombine.high %v1530_v12, %v1530_v12 }
  0x2b   :  { %1000 = vmatpush3.msra.mxu1 %v143_v23  ;;  %966 = vmatprep.subr.mxu0 %v126_v24  ;;  %v99_v18 = vld [vmem:[%s1653_s1 + $0x208] sm:$0xff]  ;;  %v98_v23 = vld [vmem:[%s1653_s1 + $0x200] sm:$0xff]  ;;  %v1568_v24 = vcombine.high %v1539_v15, %v1539_v15 }
  0x2c   :  { %1001 = vmatprep.subr.mxu1 %v158_v25  ;;  %967 = vmatpush3.msra.mxu0 %v110_v26  ;;  %v131_v19 = vld [vmem:[%s1653_s1 + $0x308] sm:$0xff]  ;;  %v130_v25 = vld [vmem:[%s1653_s1 + $0x300] sm:$0xff] }
  0x2d   :  { %1002 = vmatpush3.msra.mxu1 %v142_v27  ;;  %968 = vmatprep.subr.mxu0 %v125_v28 }
  0x2e   :  { %1003 = vmatprep.subr.mxu1 %v157_v29  ;;  %969 = vmatpush3.msra.mxu0 %v109_v30  ;;  %v887_v30 = vld [vmem:[%s1654_s2] ss:$0 sm:$0xff] }
  0x2f   :  { %1004 = vmatpush3.msra.mxu1 %v141_v31  ;;  %970 = vmatprep.subr.mxu0 %v124_v33 }
  0x30   :  { %1005 = vmatprep.subr.mxu1 %v156_v34  ;;  %971 = vmatpush3.msra.mxu0 %v108_v35 }
  0x31   :  { %1006 = vmatpush3.msra.mxu1 %v140_v36  ;;  %972 = vmatprep.subr.mxu0 %v123_v37 }
  0x32   :  { %1007 = vmatprep.subr.mxu1 %v155_v38  ;;  %973 = vmatpush3.msra.mxu0 %v107_v39  ;;  %v495_v39 = vand.u32 127, %v175_v32 }
  0x33   :  { %1008 = vmatpush3.msra.mxu1 %v139_v40  ;;  %974 = vmatprep.subr.mxu0 %v122_v41 }
  0x34   :  { %1009 = vmatprep.subr.mxu1 %v154_v43  ;;  %975 = vmatpush3.msra.mxu0 %v106_v44  ;;  %vm496_vm0 = vcmp.lt.s32.totalorder %v495_v39, 8 }
  0x35   :  { %1010 = vmatpush3.msra.mxu1 %v138_v45  ;;  %976 = vmatprep.subr.mxu0 %v121_v46  ;;  %v521_v46 = vld [vmem:[%s1655_s3] sm:$0xff] }
  0x36   :  { %1011 = vmatprep.subr.mxu1 %v153_v47  ;;  %977 = vmatpush3.msra.mxu0 %v105_v48 }
  0x37   :  { %1012 = vmatpush3.msra.mxu1 %v137_v49  ;;  %978 = vmatprep.subr.mxu0 %v120_v50  ;;  %v523_v49 = vsub.f32 %v1288_v54, %v521_v46  ;;  %v519_v46 = vld [vmem:[%s1656_s4] sm:$0x3] }
  0x38   :  { %1013 = vmatprep.subr.mxu1 %v152_v52  ;;  %979 = vmatpush3.msra.mxu0 %v104_v53 }
  0x39   :  { %1014 = vmatpush3.msra.mxu1 %v136_v55  ;;  %980 = vmatprep.subr.mxu0 %v119_v56  ;;  %v525_v50 = vmul.f32 %v523_v49, %v523_v49  ;;  %v1071_v49 = vmov 0  }
  0x3a   :  { %1015 = vmatprep.subr.mxu1 %v151_v57  ;;  %981 = vmatpush3.msra.mxu0 %v103_v59  ;;  %v522_v57 = vld [vmem:[%s1655_s3 + $0x8] sm:$0xff] }
  0x3b   :  { %1016 = vmatpush3.msra.mxu1 %v135_v60  ;;  %982 = vmatprep.subr.mxu0 %v118_v61  ;;  %v529_v32 = vcombine.high %v525_v50, %v525_v50  ;;  %v536_v52 = vrot.slane %v525_v50, %v1277_v51  ;;  %v524_v54 = vsub.f32 %v1488_v58, %v522_v57 }
  0x3c   :  { %1017 = vmatprep.subr.mxu1 %v150_v63  ;;  %983 = vmatpush3.msra.mxu0 %v102_v0 }
  0x3d   :  { %1018 = vmatpush3.msra.mxu1 %v134_v1  ;;  %984 = vmatprep.subr.mxu0 %v117_v4  ;;  %v543_v53 = vrot.slane %v529_v32, %v1277_v51  ;;  %v544_v55 = vcombine.high %v536_v52, %v536_v52  ;;  %v571_v56 = vsel %vm498_vm1, %v536_v52, 0.0  ;;  %v526_v1 = vmul.f32 %v524_v54, %v524_v54 }
  0x3e   :  { %1019 = vmatprep.subr.mxu1 %v149_v5  ;;  %985 = vmatpush3.msra.mxu0 %v101_v6  ;;  %v1072_v32 = vmov 0.0  }
  0x3f   :  { %1020 = vmatpush3.msra.mxu1 %v133_v7  ;;  %986 = vmatprep.subr.mxu0 %v116_v9  ;;  %v545_v59 = vcombine.high %v543_v53, %v543_v53  ;;  %v572_v60 = vsel %vm498_vm1, %v544_v55, 0.0  ;;  %v574_v61 = vsel %vm498_vm1, %v543_v53, 0.0  ;;  %v546_v4 = vcombine.high %v526_v1, %v526_v1 }
  0x40   :  { %1021 = vmatprep.subr.mxu1 %v148_v10  ;;  %987 = vmatpush3.msra.mxu0 %v100_v13  ;;  %v573_v63 = vadd.f32 %v572_v60, %v571_v56  ;;  %v553_v5 = vrot.slane %v526_v1, %v1277_v51 }
  0x41   :  { %1022 = vmatpush3.msra.mxu1 %v132_v14  ;;  %988 = vmatprep.subr.mxu0 %v115_v16  ;;  %v576_v0 = vsel %vm498_vm1, %v545_v59, 0.0  ;;  %v560_v7 = vrot.slane %v546_v4, %v1277_v51 }
  0x42   :  { %1023 = vmatprep.subr.mxu1 %v147_v17  ;;  %989 = vmatpush3.msra.mxu0 %v99_v18  ;;  %v575_v2 = vadd.f32 %v574_v61, %v573_v63  ;;  %v561_v9 = vcombine.high %v553_v5, %v553_v5  ;;  %v578_v10 = vsel %vm498_vm1, %v553_v5, 0.0 }
  0x43   :  { %1024 = vmatpush3.msra.mxu1 %v131_v19  ;;  %990 = vmatprep.subr.mxu0 %v114_v20  ;;  %v562_v14 = vcombine.high %v560_v7, %v560_v7  ;;  %v582_v58 = vsel %vm498_vm1, %v560_v7, 0.0 }
  0x44   :  { %1025 = vmatprep.subr.mxu1 %v146_v21  ;;  %991 = vmatpush3.msra.mxu0 %v98_v23  ;;  %v577_v6 = vadd.f32 %v576_v0, %v575_v2  ;;  %v580_v16 = vsel %vm498_vm1, %v561_v9, 0.0 }
  0x45   :  { %417 = vmatprep.mubr.f32.mxu0 %v1561_v22  ;;  %1026 = vmatpush3.msra.mxu1 %v130_v25  ;;  %v584_v18 = vsel %vm498_vm1, %v562_v14, 0.0 }
  0x46   :  { %487 = vmatprep.mubr.f32.mxu1 %v1568_v24  ;;  %418 = vmatmul.mubr.f32.vlgmr.msra.gmra.mxu0 %v1530_v12  ;;  %v579_v13 = vadd.f32 %v578_v10, %v577_v6 }
  0x47   :  { %488 = vmatmul.mubr.f32.vlgmr.msra.gmra.mxu1 %v1539_v15 }
  0x48   :  { %v581_v17 = vadd.f32 %v580_v16, %v579_v13 }
  0x4a   :  { %v583_v19 = vadd.f32 %v582_v58, %v581_v17 }
  0x4c   :  { %v585_v20 = vadd.f32 %v584_v18, %v583_v19 }
  0x4e   :  { %586 = vadd.xlane.f32.xlu1 %v585_v20 }
  0xe4   :  { %v922_v26 = vpop.f32.mrf.mxu0 }
  0xe6   :  { %v957_v27 = vpop.f32.mrf.mxu1  ;;  %v923_v28 = vpop.f32.mrf.mxu0 }
  0xe7   :  { %v924_v29 = vadd.f32 %v923_v28, %v922_v26 }
  0xe8   :  { %v958_v31 = vpop.f32.mrf.mxu1 }
  0xe9   :  { %v280_v33 = vadd.f32 %v924_v29, %v887_v30  ;;  %v959_v34 = vadd.f32 %v958_v31, %v957_v27 }
  0xeb   :  { %v350_v40 = vadd.f32 %v959_v34, %v280_v33  ;;  %v587_v33 = vpop.xlane.xlu1 %586 }
  0xec   :  { %1040 = vrsqrt.f32 %v587_v33  ;;  %vm590_vm4 = vcmp.eq.f32.partialorder %v587_v33, inf  ;;  %vm592_vm5 = vcmp.eq.f32.partialorder %v587_v33, 0.0 }
  0xf9   :  { %v1041_v34 = vpop.eup %1040 }
 0x106   :  { %v992_v35 = vpop.f32.mrf.mxu0 }
 0x107   :  { %v1027_v36 = vpop.f32.mrf.mxu1 }
 0x108   :  { %v993_v37 = vpop.f32.mrf.mxu0 }
 0x109   :  { %v1028_v38 = vpop.f32.mrf.mxu1  ;;  %v994_v41 = vadd.f32 %v993_v37, %v992_v35  ;;  %v589_v35 = vmul.f32 %v1041_v34, %v587_v33 }
 0x10a   :  { %v1029_v44 = vadd.f32 %v1028_v38, %v1027_v36  ;;  %v593_v36 = vand.u32 2147483648, %v587_v33  ;;  %v596_v38 = vld [vmem:[%s1658_s6] sm:$0x3] }
 0x10b   :  { %v420_v43 = vadd.f32 %v994_v41, %v350_v40  ;;  %v591_v37 = vsel %vm590_vm4, %v587_v33, %v589_v35  ;;  %v595_v41 = vld [vmem:[%s1657_s5] sm:$0x3]  ;;  %vm597_vm6 = vcmp.ne.s32.totalorder %v596_v38, 0 }
 0x10c   :  { %v594_v40 = vsel %vm592_vm5, %v593_v36, %v591_v37  ;;  %vm599_vm9 = vmxor %vm597_vm6, %vm1070_vm8 }
 0x10d   :  { %v490_v45 = vadd.f32 %v1029_v44, %v420_v43  ;;  %vm598_vm7 = vcmp.lt.f32.partialorder %v594_v40, %v595_v41 }
 0x10e   :  { %vm600_vm11 = vmor %vm598_vm7, %vm599_vm9 }
 0x10f   :  { %493 = vst [vmem:[#allocation5] sm:$0x3] %v490_v45  ;;  %v497_v47 = vsel %vm496_vm0, %v490_v45, -inf }
 0x110   :  { %v499_v48 = vsel %vm498_vm1, %v497_v47, -inf }
 0x111   :  { %500 = vmax.xlane.f32.xlu0 %v499_v48 }
 0x19a   :  { %v501_v21 = vpop.xlane.xlu0 %500 }
 0x19b   :  { %vm502_vm2 = vcmp.ge.f32.partialorder %v497_v47, %v501_v21 }
 0x19c   :  { %v503_v23 = vsel %vm502_vm2, %v495_v39, 128 }
 0x19d   :  { %v504_v25 = vsel %vm498_vm1, %v503_v23, 2147483647  ;;  %vm624_vm1 = vcmask 0  }
 0x19e   :  { %v506_v26 = vshra.s32 %v504_v25, 16  ;;  %v505_v28 = vand.u32 65535, %v504_v25 }
 0x1a0   :  { %v508_v27 = vcvt.s32.f32 %v506_v26  ;;  %v507_v30 = vcvt.s32.f32 %v505_v28 }
 0x1a2   :  { %509 = vmin.xlane.f32.xlu0 %v508_v27 }
 0x22b   :  { %v510_v29 = vpop.xlane.xlu0 %509 }
 0x22c   :  { %vm511_vm3 = vcmp.eq.f32.partialorder %v508_v27, %v510_v29  ;;  %v516_v39 = vcvt.f32.s32 %v510_v29 }
 0x22d   :  { %v512_v31 = vsel %vm511_vm3, %v507_v30, inf }
 0x22e   :  { %513 = vmin.xlane.f32.xlu1 %v512_v31  ;;  %v517_v44 = vshll.u32 %v516_v39, 16 }
 0x2b7   :  { %v514_v43 = vpop.xlane.xlu1 %513 }
 0x2b8   :  { %v515_v45 = vcvt.f32.s32 %v514_v43 }
 0x2ba   :  { %v518_v47 = vadd.s32 %v517_v44, %v515_v45 }
 0x2bc   :  { %vm520_vm12 = vcmp.ne.s32.totalorder %v518_v47, %v519_v46 }
 0x2bd   :  { %vm601_vm14 = vmand %vm520_vm12, %vm600_vm11 }
 0x2be   :  { %vm608_vm15 = vmand %vm601_vm14, %vm607_vm10 }
 0x2bf   :  { %v609_v48 = vsel %vm608_vm15, %v594_v40, %v595_v41  ;;  %vm612_vm0 = vmor %vm597_vm6, %vm608_vm15  ;;  %v615_v50 = vsel %vm608_vm15, 1, %v1071_v49  ;;  %v888_v52 = vsel %vm608_vm15, 1.0, %v1072_v32 }
 0x2c0   :  { %611 = vst.msk [vmem:[%s1662_s10] sm:$0x3] %vm610_vm13, %v609_v48  ;;  %v613_v53 = vsel %vm612_vm0, 1, %v1071_v49  ;;  %v617_v55 = vsel %vm610_vm13, %v888_v52, -inf }
 0x2c1   :  { %614 = vst.msk [vmem:[%s1663_s11] sm:$0x3] %vm610_vm13, %v613_v53  ;;  %v618_v42 = vrot.slane %v617_v55, 4 }
 0x2c3   :  { %v619_v56 = vmax.f32 %v617_v55, %v618_v42 }
 0x2c5   :  { %v620_v57 = vrot.slane %v619_v56, 2 }
 0x2c7   :  { %v621_v59 = vmax.f32 %v619_v56, %v620_v57 }
 0x2c9   :  { %v622_v60 = vrot.slane %v621_v59, 1 }
 0x2cb   :  { %v623_v61 = vmax.f32 %v621_v59, %v622_v60 }
 0x2cd   :  { %625 = vst.msk [vmem:[#allocation3] sm:$0x1] %vm624_vm1, %v623_v61 }
 0x2d4   :  { %v626_v54 = vld [vmem:[#allocation3] sm:$0x1] }
 0x2d5   :  { %1030 = vpush %v626_v54 }
 0x306   :  { %s1031_s18 = spop %1030 }
 0x307   :  { %p628_p0 = scmp.gt.f32.partialorder %s1031_s18, 0.0 }
 0x308   :  { %v670_v63 = vld [vmem:[%s1659_s7] sm:$0xff] (%p628_p0)  ;;  %v672_v0 = vld [vmem:[%s1659_s7 + $0x8] sm:$0xff] (%p628_p0) }
 0x309   :  { %631 = sbr.rel (!%p628_p0) target bundleno = 923 (0x39b), region = 33 }
 0x30e   :  { %681 = vsyncadd [#allocation4], 256 }
 0x30f   :  { %1063 = dma.done.wait [#allocation4], 256 }
 0x310   :  { %1064 = vsyncadd [#allocation4], 4294967040  ;;  %v1073_v1 = vmov 0   ;;  %v694_v2 = vcombine.high %v670_v63, %v670_v63  ;;  %v711_v4 = vcombine.high %v672_v0, %v672_v0  ;;  %v701_v5 = vrot.slane %v670_v63, %v1277_v51 }
 0x311   :  { %1042 = vset.pattern.permute.xlu0 %v1073_v1  ;;  %v718_v7 = vrot.slane %v672_v0, %v1277_v51 }
 0x312   :  { %689 = vperm.xlu0 %1042, %v615_v50   ;;  %v708_v6 = vrot.slane %v694_v2, %v1277_v51  ;;  %v725_v9 = vrot.slane %v711_v4, %v1277_v51  ;;  %v709_v10 = vcombine.high %v701_v5, %v701_v5 }
 0x313   :  { %v726_v14 = vcombine.high %v718_v7, %v718_v7 }
 0x314   :  { %v710_v13 = vcombine.high %v708_v6, %v708_v6  ;;  %v727_v16 = vcombine.high %v725_v9, %v725_v9 }
 0x38d   :  { %v690_v58 = vpop.permute.xlu0 %689 }
 0x38e   :  { %vm691_vm2 = vcmp.eq.s32.totalorder %v690_v58, 1 }
 0x38f   :  { %v736_v17 = vsel %vm691_vm2, %v1312_v62, %v701_v5  ;;  %v737_v18 = vsel %vm691_vm2, %v1343_v8, %v709_v10  ;;  %v738_v19 = vsel %vm691_vm2, %v1327_v3, %v708_v6  ;;  %v739_v20 = vsel %vm691_vm2, %v1353_v11, %v710_v13 }
 0x390   :  { %v740_v21 = vsel %vm691_vm2, %v1530_v12, %v718_v7  ;;  %v741_v23 = vsel %vm691_vm2, %v1561_v22, %v726_v14  ;;  %v742_v25 = vsel %vm691_vm2, %v1539_v15, %v725_v9  ;;  %v743_v26 = vsel %vm691_vm2, %v1568_v24, %v727_v16 }
 0x391   :  { %v752_v27 = vcombine.low %v736_v17, %v737_v18  ;;  %v753_v28 = vcombine.low %v738_v19, %v739_v20  ;;  %v769_v29 = vcombine.low %v740_v21, %v741_v23  ;;  %v770_v30 = vcombine.low %v742_v25, %v743_v26 }
 0x393   :  { %v760_v62 = vrot.slane %v752_v27, %v1277_v51  ;;  %v767_v8 = vrot.slane %v753_v28, %v1277_v51  ;;  %v777_v3 = vrot.slane %v769_v29, %v1277_v51  ;;  %v784_v11 = vrot.slane %v770_v30, %v1277_v51 }
 0x395   :  { %v768_v31 = vcombine.low %v760_v62, %v767_v8  ;;  %v785_v12 = vcombine.low %v777_v3, %v784_v11 }
 0x397   :  { %826 = vst [vmem:[%s1661_s9] sm:$0xff] %v768_v31  ;;  %828 = vst [vmem:[%s1661_s9 + $0x8] sm:$0xff] %v785_v12 }
 0x398   :  { %836 = vsyncadd [#allocation4], 256 }
 0x399   :  { %1065 = dma.done.wait [#allocation4], 256 }
 0x39a   :  { %1066 = vsyncadd [#allocation4], 4294967040 }
 0x39b PF:  { %s1074_s24 = smov [#allocation5]  }
 0x39c   :  { %s845_s25 = sshll.u32 %s1074_s24, 4  ;;  %s846_s25 = int_to_ptr.vmem [resolvable:$true] %s845_s25 }
 0x39d   :  { %s1043_s26 = scalar_lea.vmem %s846_s25, 32  ;;  %p1048_p2 = scmp.lt.s32.totalorder %s846_s25, %s846_s25 }
 0x39e   :  { %p1044_p1 = scmp.ne.s32.totalorder %s846_s25, %s1043_s26  ;;  %p1049_p3 = scmp.lt.s32.totalorder %s1043_s26, %s1043_s26 }
 0x3a0   :  { %p1050_p4 = por %p1049_p3, %p1048_p2 }
 0x3a2   :  { %p1051_p5 = pnand %p1050_p4, %p1044_p1 }
 0x3a4   :  { %1054 = shalt.err (!%p1051_p5)
}
 0x3a5   :  { %848 = dma.vmem_to_hbm [thread:$0]  %s846_s25, 32, %s1660_s8, [#allocation6]  }
 0x3a6   :  { %1067 = dma.done.wait [#allocation6], 32  }
 0x3a7   :  { %1068 = vsyncadd [#allocation6], 4294967264 }
 0x3a8   :  { %860 = vsyncpa [#allocation6], 1 }
 0x3a9   :  { %861 = vsyncmov [#allocation4] }
 0x3ac   :  { %s862_s9 = vpop.sfrf %861 }
 0x3ad   :  { %p889_p6 = scmp.ne.s32.totalorder %s862_s9, 0 }
 0x3af   :  { %866 = shalt.err (%p889_p6)  }

</bundles_post_ra>
